<compile_context>
chip_gen: v7x
topology: tpu7x:2x2x1
jax: 0.10.0
libtpu: 0.0.40
codegen_flags: <defaults>
</compile_context>

<pallas_src>
import functools

import jax
import jax.numpy as jnp
from jax.experimental import pallas as pl
from jax.experimental.pallas import tpu as pltpu

LANE = 128  # TPU lane width


def ensemble_fused_kernel(x_ref, w1_ref, wbig_ref, out_ref, *, dd, a, vpad):
    """Fused ensemble forward in one step.

    x_ref    : (Bpad, D)  f32   flattened NCHW input, batch padded to 8 sublanes
    w1_ref   : (Dpad, kpad) bf16
                 rows [0, D)   : layer-1 weights of ALL models (K = M*Hd, zero-padded),
                                 plus an all-zero column feeding the constant-1 lane
                 row  D        : b1 for all models, with 1.0 at lane K (constant lane)
                 row  D+1      : post-tanh ensemble weights (first M lanes)
    wbig_ref : (kpad, a+vpad) bf16
                 [weight-scaled policy heads | block-diag value heads];
                 row K carries [bp_ens | bv] via the constant-1 hidden lane
    out_ref  : (Bpad, a+vpad) f32
                 lanes [0, a)      : ensemble policy
                 lanes [a, a+vpad) : ensemble value broadcast across the lane group
    """
    xb = x_ref[...].astype(jnp.bfloat16)                       # bf16 MXU-native
    w1 = w1_ref[0:dd, :]                                       # (D, kpad) bf16
    b1 = w1_ref[dd:dd + 1, :].astype(jnp.float32)              # (1, kpad) incl. const-1 lane
    wts = w1_ref[dd + 1:dd + 2, 0:vpad].astype(jnp.float32)    # (1, vpad) ensemble weights

    # Layer 1 for all M models at once (f32 accumulate). Padded hidden lanes give
    # relu(0 + 0) = 0; lane K gives relu(0 + 1) = 1 and carries the head biases.
    h = jnp.maximum(
        jnp.dot(xb, w1, preferred_element_type=jnp.float32) + b1, 0.0)

    # One wide matmul: columns [0, a) are the ensemble policy (ensemble weights and
    # bp pre-folded; contraction over the fused M*Hd axis == sum over models);
    # columns [a, a+vpad) are per-model pre-tanh values (block-diagonal heads + bv).
    big = jnp.dot(h.astype(jnp.bfloat16), wbig_ref[...],
                  preferred_element_type=jnp.float32)

    out_ref[:, 0:a] = big[:, 0:a]

    # Padded value lanes are exactly 0 pre-tanh AND carry 0 ensemble weight, so they
    # drop out of the lane reduce. Post-tanh weighting matches the module semantics.
    val_m = jnp.tanh(big[:, a:]) * wts                         # f32 on VPU/EUP
    val = jnp.sum(val_m, axis=-1, keepdims=True)               # XLU lane reduce
    out_ref[:, a:] = jnp.broadcast_to(val, (val.shape[0], vpad))  # lane-dense store


def pack_ensemble_params(params, weights):
    """One-time parameter packing: fold ensemble weights into the linear policy head,
    fuse the model axis into the matmul K/N dims, fold all biases + ensemble weights
    into the two weight buffers, pad to lane/sublane-dense shapes, store in bf16."""
    w1, b1, wp, bp, wv, bv = params
    M, D, Hd = w1.shape
    A = wp.shape[-1]
    K = M * Hd
    kpad = ((K + 1 + LANE - 1) // LANE) * LANE   # +1 for the constant bias lane
    vpad = LANE
    assert M < vpad, "ensemble size must fit in one lane group"
    assert D % 8 == 0, "flattened input dim must be sublane aligned"

    # --- W1 buffer: layer-1 weights for all models + 2 aux rows (b1 | ens weights) ---
    w1_all = jnp.transpose(w1, (1, 0, 2)).reshape(D, K)        # column order (m, hd)
    rows = ((D + 2 + 7) // 8) * 8
    w1buf = jnp.zeros((rows, kpad), jnp.float32)
    w1buf = w1buf.at[:D, :K].set(w1_all)
    w1buf = w1buf.at[D, :K].set(b1.reshape(K))                 # layer-1 biases
    w1buf = w1buf.at[D, K].set(1.0)                            # constant-1 hidden lane
    w1buf = w1buf.at[D + 1, :M].set(weights)                   # post-tanh ens. weights
    w1buf = w1buf.astype(jnp.bfloat16)

    # --- Wide RHS: [ensemble-weighted policy | block-diag value], biases on row K ---
    wp_scaled = (wp * weights[:, None, None]).reshape(K, A)    # fold weights (linear head)
    bp_ens = jnp.sum(bp[:, 0, :] * weights[:, None], axis=0)   # (A,)
    wbig = jnp.zeros((kpad, A + vpad), jnp.float32)
    wbig = wbig.at[:K, :A].set(wp_scaled)
    for m in range(M):                                         # block-diag value heads
        wbig = wbig.at[m * Hd:(m + 1) * Hd, A + m].set(wv[m, :, 0])
    wbig = wbig.at[K, :A].set(bp_ens)                          # via constant-1 lane
    wbig = wbig.at[K, A:A + M].set(bv[:, 0, 0])
    wbig = wbig.astype(jnp.bfloat16)

    dims = dict(dd=D, kpad=kpad, a=A, vpad=vpad)
    return (w1buf, wbig), dims


def model_ensemble_forward(x_nchw, packed, dims):
    """x_nchw: (B, C, H, W) float32. Returns (policy (B, A), value (B, 1))."""
    B = x_nchw.shape[0]
    x_flat = x_nchw.reshape(B, -1).astype(jnp.float32)  # matches torch .view(B, -1)
    w1buf, wbig = packed
    D, kpad, A, vpad = dims["dd"], dims["kpad"], dims["a"], dims["vpad"]

    # Pad batch to a full sublane group (full-tile loads/stores, no masked vst).
    bpad = max(8, ((B + 7) // 8) * 8)
    if bpad != B:
        x_flat = jnp.pad(x_flat, ((0, bpad - B), (0, 0)))

    kernel = functools.partial(ensemble_fused_kernel, dd=D, a=A, vpad=vpad)
    vmem = pl.BlockSpec(memory_space=pltpu.MemorySpace.VMEM)

    # Advisory cost hint so XLA overlaps surrounding graph work with this tiny call.
    cost = pl.CostEstimate(
        flops=2 * bpad * (D * kpad + kpad * (A + vpad)),
        transcendentals=bpad * vpad,
        bytes_accessed=(x_flat.size * 4 + w1buf.size * 2 + wbig.size * 2
                        + bpad * (A + vpad) * 4),
    )

    # TODO(synk): when batching many MCTS positions per call, tile the batch with a
    # grid axis + (TILE_B, ...) BlockSpecs and mark it "parallel" in
    # CompilerParams(dimension_semantics=...) to use v7x's second TensorCore; at B=2
    # the kernel is purely latency bound so it stays a single gridless invocation.
    out = pl.pallas_call(
        kernel,
        out_shape=jax.ShapeDtypeStruct((bpad, A + vpad), jnp.float32),
        in_specs=[vmem, vmem, vmem],      # whole arrays resident in VMEM (<0.4 MiB)
        out_specs=vmem,
        cost_estimate=cost,
    )(x_flat, w1buf, wbig)

    policy = out[:B, :A]
    value = out[:B, A:A + 1]
    return policy, value


def reference_forward(x_nchw, params, weights):
    """Pure-JAX f32 reference reproducing ModelEnsemble.forward semantics."""
    B = x_nchw.shape[0]
    x_flat = x_nchw.reshape(B, -1)
    w1, b1, wp, bp, wv, bv = params
    hi = jax.lax.Precision.HIGHEST
    policies, values = [], []
    for m in range(w1.shape[0]):
        h = jnp.maximum(jnp.dot(x_flat, w1[m], precision=hi) + b1[m, 0], 0.0)
        p = jnp.dot(h, wp[m], precision=hi) + bp[m, 0]
        v = jnp.tanh(jnp.dot(h, wv[m], precision=hi) + bv[m, 0])
        policies.append(p * weights[m])
        values.append(v * weights[m])
    return jnp.stack(policies).sum(0), jnp.stack(values).sum(0)


if __name__ == "__main__":
    # Small deterministic setup: M=3 ensemble members, input (B=2, C=4, H=16, W=16),
    # hidden=32, num_actions = H*W = 256 (board-size^2 policy head).
    M, B, C, H, W = 3, 2, 4, 16, 16
    D = C * H * W          # 1024
    Hd = 32
    A = H * W              # 256

    key = jax.random.PRNGKey(0)
    kx, k1, k2, k3, k4, k5, k6 = jax.random.split(key, 7)

    x = jax.random.normal(kx, (B, C, H, W), dtype=jnp.float32)

    scale = 0.05
    w1 = jax.random.normal(k1, (M, D, Hd), dtype=jnp.float32) * scale
    b1 = jax.random.normal(k2, (M, 1, Hd), dtype=jnp.float32) * scale
    wp = jax.random.normal(k3, (M, Hd, A), dtype=jnp.float32) * scale
    bp = jax.random.normal(k4, (M, 1, A), dtype=jnp.float32) * scale
    wv = jax.random.normal(k5, (M, Hd, 1), dtype=jnp.float32) * scale
    bv = jax.random.normal(k6, (M, 1, 1), dtype=jnp.float32) * scale
    params = (w1, b1, wp, bp, wv, bv)

    # Default ModelEnsemble weights: uniform 1/len(models).
    weights = jnp.full((M,), 1.0 / M, dtype=jnp.float32)

    # One-time param packing (weight folding / bf16 cast happens here, not per forward).
    packed, dims = pack_ensemble_params(params, weights)
    packed = jax.tree_util.tree_map(jax.block_until_ready, packed)

    policy, value = model_ensemble_forward(x, packed, dims)
    policy = jax.block_until_ready(policy)
    value = jax.block_until_ready(value)

    ref_policy, ref_value = reference_forward(x, params, weights)
    assert policy.shape == (B, A) and value.shape == (B, 1)
    # bf16 weight storage (per perf review) => compare at bf16-appropriate tolerance.
    assert jnp.allclose(policy, ref_policy, atol=1e-2, rtol=1e-2), \
        float(jnp.max(jnp.abs(policy - ref_policy)))
    assert jnp.allclose(value, ref_value, atol=1e-2, rtol=1e-2), \
        float(jnp.max(jnp.abs(value - ref_value)))

    # TODO(synk): checkpoint save/load, ModelMetadata, and nn.ModuleList management are
    # host-side bookkeeping with no Pallas equivalent; only forward() is implemented.
    print("KERNEL_OK")
</pallas_src>

<mosaic_0001>
module attributes {stable_mosaic.version = 11 : i64} {
  func.func @ensemble_fused_kernel(%arg0: memref<8x1024xf32, #tpu.memory_space<vmem>>, %arg1: memref<1032x128xbf16, #tpu.memory_space<vmem>>, %arg2: memref<128x384xbf16, #tpu.memory_space<vmem>>, %arg3: memref<8x384xf32, #tpu.memory_space<vmem>>) attributes {dimension_semantics = [], scalar_prefetch = 0 : i64, scratch_operands = 0 : i64, tpu.core_type = #tpu.core_type<tc>} {
    %c0 = arith.constant 0 : index
    %c0_0 = arith.constant 0 : index
    %0 = vector.load %arg0[%c0, %c0_0] : memref<8x1024xf32, #tpu.memory_space<vmem>>, vector<8x1024xf32>
    %1 = arith.truncf %0 : vector<8x1024xf32> to vector<8x1024xbf16>
    %c0_1 = arith.constant 0 : index
    %c0_2 = arith.constant 0 : index
    %2 = vector.load %arg1[%c0_1, %c0_2] : memref<1032x128xbf16, #tpu.memory_space<vmem>>, vector<1024x128xbf16>
    %c1024 = arith.constant 1024 : index
    %c0_3 = arith.constant 0 : index
    %3 = vector.load %arg1[%c1024, %c0_3] : memref<1032x128xbf16, #tpu.memory_space<vmem>>, vector<1x128xbf16>
    %4 = arith.extf %3 : vector<1x128xbf16> to vector<1x128xf32>
    %c1025 = arith.constant 1025 : index
    %c0_4 = arith.constant 0 : index
    %5 = vector.load %arg1[%c1025, %c0_4] : memref<1032x128xbf16, #tpu.memory_space<vmem>>, vector<1x128xbf16>
    %6 = arith.extf %5 : vector<1x128xbf16> to vector<1x128xf32>
    %cst = arith.constant dense<0.000000e+00> : vector<8x128xf32>
    %7 = tpu.matmul %1, %2, %cst {dimension_numbers = #tpu.dot_dimension_numbers<[1], [0], [0], [1], [0, 0, 1, 1], [], []>} : vector<8x1024xbf16>, vector<1024x128xbf16>, vector<8x128xf32> -> vector<8x128xf32>
    %8 = vector.broadcast %4 : vector<1x128xf32> to vector<8x128xf32>
    %9 = arith.addf %7, %8 : vector<8x128xf32>
    %cst_5 = arith.constant 0.000000e+00 : f32
    %10 = vector.broadcast %cst_5 : f32 to vector<8x128xf32>
    %11 = arith.maximumf %9, %10 : vector<8x128xf32>
    %12 = arith.truncf %11 : vector<8x128xf32> to vector<8x128xbf16>
    %c0_6 = arith.constant 0 : index
    %c0_7 = arith.constant 0 : index
    %13 = vector.load %arg2[%c0_6, %c0_7] : memref<128x384xbf16, #tpu.memory_space<vmem>>, vector<128x384xbf16>
    %cst_8 = arith.constant dense<0.000000e+00> : vector<8x384xf32>
    %14 = tpu.matmul %12, %13, %cst_8 {dimension_numbers = #tpu.dot_dimension_numbers<[1], [0], [0], [1], [0, 0, 1, 1], [], []>} : vector<8x128xbf16>, vector<128x384xbf16>, vector<8x384xf32> -> vector<8x384xf32>
    %15 = vector.extract_strided_slice %14 {offsets = [0, 0], sizes = [8, 256], strides = [1, 1]} : vector<8x384xf32> to vector<8x256xf32>
    %c0_9 = arith.constant 0 : index
    %c0_10 = arith.constant 0 : index
    %16 = vector.load %arg3[%c0_9, %c0_10] : memref<8x384xf32, #tpu.memory_space<vmem>>, vector<8x256xf32>
    tpu.vector_store %arg3[%c0_9, %c0_10], %15 {strides = array<i32>} : memref<8x384xf32, #tpu.memory_space<vmem>>, vector<8x256xf32>,
    %17 = vector.extract_strided_slice %14 {offsets = [0, 256], sizes = [8, 128], strides = [1, 1]} : vector<8x384xf32> to vector<8x128xf32>
    %18 = math.tanh %17 : vector<8x128xf32>
    %19 = vector.broadcast %6 : vector<1x128xf32> to vector<8x128xf32>
    %20 = arith.mulf %18, %19 : vector<8x128xf32>
    %cst_11 = arith.constant dense<0.000000e+00> : vector<8xf32>
    %21 = vector.multi_reduction <add>, %20, %cst_11 [1] : vector<8x128xf32> to vector<8xf32>
    %22 = vector.shape_cast %21 : vector<8xf32> to vector<8x1xf32>
    %23 = vector.shape_cast %22 : vector<8x1xf32> to vector<8x1xf32>
    %24 = vector.broadcast %23 : vector<8x1xf32> to vector<8x128xf32>
    %c0_12 = arith.constant 0 : index
    %c256 = arith.constant 256 : index
    %25 = vector.load %arg3[%c0_12, %c256] : memref<8x384xf32, #tpu.memory_space<vmem>>, vector<8x128xf32>
    tpu.vector_store %arg3[%c0_12, %c256], %24 {strides = array<i32>} : memref<8x384xf32, #tpu.memory_space<vmem>>, vector<8x128xf32>,
    return
  }
}

</mosaic_0001>

<bundles_post_ra>
// kernel: tpu_custom_call.1
= control target key start
LH: loop header
LB: loop body
LE: loop exit
PB: predicated region body
PF: predicated region fallthrough
CT: control target
= control target key end

     0   :  { %8 = vsyncpa [#allocation3], 0  ;;  %s1506_s0 = inlined_call_operand.hbm [shape: f32[8,1024], index: 0, kind: input, shape index: {}]   ;;  %s1507_s1 = inlined_call_operand.hbm [shape: bf16[1032,128], index: 1, kind: input, shape index: {}]   ;;  %s1508_s2 = inlined_call_operand.hbm [shape: bf16[128,384], index: 2, kind: input, shape index: {}]   ;;  %s1509_s3 = inlined_call_operand.hbm [shape: f32[8,384], index: 3, kind: output, shape index: {}]  }
   0x1   :  { %9 = vsyncpa [#allocation6], 0 }
   0x2   :  { %10 = vsyncpa [#allocation4], 0  ;;  %s1427_s12 = smov [#allocation5]   ;;  %s1333_s16 = scalar_lea.hbm %s1507_s1, 8256 }
   0x3   :  { %s26_s13 = sshll.u32 %s1427_s12, 4  ;;  %p1334_p0 = scmp.ne.s32.totalorder %s1507_s1, %s1333_s16  ;;  %s27_s13 = int_to_ptr.vmem [resolvable:$true] %s26_s13 }
   0x4   :  { %p1337_p1 = scmp.lt.u32.totalorder %s1333_s16, %s1507_s1 }
   0x6   :  { %p1339_p2 = pnand %p1337_p1, %p1334_p0 }
   0x8   :  { %1342 = shalt.err (!%p1339_p2)
}
   0x9   :  { %s1343_s21 = scalar_lea.vmem %s27_s13, 8256  ;;  %p1348_p4 = scmp.lt.s32.totalorder %s27_s13, %s27_s13 }
   0xa   :  { %p1344_p3 = scmp.ne.s32.totalorder %s27_s13, %s1343_s21  ;;  %p1349_p5 = scmp.lt.s32.totalorder %s1343_s21, %s1343_s21 }
   0xc   :  { %p1350_p6 = por %p1349_p5, %p1348_p4 }
   0xe   :  { %p1351_p7 = pnand %p1350_p6, %p1344_p3 }
  0x10   :  { %1354 = shalt.err (!%p1351_p7)
}
  0x11   :  { %s1428_s22 = smov 64   ;;  %s1429_s23 = smov 4  }
  0x12   :  { %32 = dma.hbm_to_vmem [thread:$0]  %s1507_s1, 8256, %s27_s13, [#allocation6], %s1428_s22, %s1428_s22, %s1429_s23  }
  0x13   :  { %s1430_s26 = smov [#allocation2]   ;;  %s1431_s28 = smov [#allocation7]  }
  0x14   :  { %s17_s27 = sshll.u32 %s1430_s26, 4  ;;  %s38_s29 = sshll.u32 %s1431_s28, 4  ;;  %s18_s27 = int_to_ptr.vmem [resolvable:$true] %s17_s27  ;;  %s39_s29 = int_to_ptr.vmem [resolvable:$true] %s38_s29 }
  0x15   :  { %s1355_s5 = scalar_lea.hbm %s1506_s0, 1024 }
  0x16   :  { %p1356_p8 = scmp.ne.s32.totalorder %s1506_s0, %s1355_s5  ;;  %p1359_p9 = scmp.lt.u32.totalorder %s1355_s5, %s1506_s0 }
  0x18   :  { %p1361_p10 = pnand %p1359_p9, %p1356_p8 }
  0x1a   :  { %1364 = shalt.err (!%p1361_p10)
}
  0x1b   :  { %s1365_s1 = scalar_lea.vmem %s18_s27, 1024  ;;  %p1370_p12 = scmp.lt.s32.totalorder %s18_s27, %s18_s27 }
  0x1c   :  { %p1366_p11 = scmp.ne.s32.totalorder %s18_s27, %s1365_s1  ;;  %p1371_p13 = scmp.lt.s32.totalorder %s1365_s1, %s1365_s1 }
  0x1e   :  { %p1372_p0 = por %p1371_p13, %p1370_p12 }
  0x20   :  { %p1373_p1 = pnand %p1372_p0, %p1366_p11 }
  0x22   :  { %1376 = shalt.err (!%p1373_p1)
}
  0x23   :  { %20 = dma.hbm_to_vmem [thread:$0]  %s1506_s0, 1024, %s18_s27, [#allocation3]  }
  0x24   :  { %s1377_s14 = scalar_lea.hbm %s1508_s2, 3072 }
  0x25   :  { %p1378_p2 = scmp.ne.s32.totalorder %s1508_s2, %s1377_s14  ;;  %p1381_p3 = scmp.lt.u32.totalorder %s1377_s14, %s1508_s2 }
  0x27   :  { %p1383_p4 = pnand %p1381_p3, %p1378_p2 }
  0x29   :  { %1386 = shalt.err (!%p1383_p4)
}
  0x2a   :  { %s1387_s19 = scalar_lea.vmem %s39_s29, 3072  ;;  %p1392_p6 = scmp.lt.s32.totalorder %s39_s29, %s39_s29 }
  0x2b   :  { %p1388_p5 = scmp.ne.s32.totalorder %s39_s29, %s1387_s19  ;;  %p1393_p7 = scmp.lt.s32.totalorder %s1387_s19, %s1387_s19 }
  0x2d   :  { %p1394_p8 = por %p1393_p7, %p1392_p6 }
  0x2f   :  { %p1395_p9 = pnand %p1394_p8, %p1388_p5 }
  0x31   :  { %1398 = shalt.err (!%p1395_p9)
}
  0x32   :  { %s1432_s0 = smov 192   ;;  %s1433_s20 = smov 12  }
  0x33   :  { %44 = dma.hbm_to_vmem [thread:$0]  %s1508_s2, 3072, %s39_s29, [#allocation6], %s1432_s0, %s1432_s0, %s1433_s20  }
  0x34   :  { %1421 = dma.done.wait [#allocation3], 1024  }
  0x35   :  { %1422 = vsyncadd [#allocation3], 4294966272 }
  0x36   :  { %1423 = dma.done.wait [#allocation6], 11328  }
  0x37   :  { %1424 = vsyncadd [#allocation6], 4294955968  ;;  %v1235_v0 = vld [vmem:[#allocation5 + $0x40] sm:$0xff]   ;;  %v1239_v4 = vld [vmem:[#allocation5 + $0x48] sm:$0xff]   ;;  %vm1436_vm0 = vmmov 0   ;;  %s1437_s2 = smov [#allocation8]  }
  0x38   :  { %v1236_v1 = vld [vmem:[#allocation5 + $0xc0] sm:$0xff]   ;;  %1107 = vmatprep.subr.bf16.mxu0 %v1235_v0  ;;  %v1240_v5 = vld [vmem:[#allocation5 + $0xc8] sm:$0xff]   ;;  %v1243_v8 = vld [vmem:[#allocation5 + $0x50] sm:$0xff]   ;;  %s1009_s23 = sshll.u32 %s1437_s2, 4  ;;  %s1010_s23 = int_to_ptr.vmem [resolvable:$true] %s1009_s23 }
  0x39   :  { %v1237_v2 = vld [vmem:[#allocation5] sm:$0xff]   ;;  %1129 = vmatprep.subr.bf16.mxu1 %v1236_v1  ;;  %v1241_v6 = vld [vmem:[#allocation5 + $0x8] sm:$0xff]   ;;  %v1244_v9 = vld [vmem:[#allocation5 + $0xd0] sm:$0xff]   ;;  %s1399_s24 = scalar_lea.vmem %s1010_s23, 384  ;;  %p1404_p11 = scmp.lt.s32.totalorder %s1010_s23, %s1010_s23 }
  0x3a   :  { %v1238_v3 = vld [vmem:[#allocation5 + $0x80] sm:$0xff]   ;;  %1108 = vmatpush3.bf16.msra.mxu0 %v1237_v2  ;;  %v1242_v7 = vld [vmem:[#allocation5 + $0x88] sm:$0xff]   ;;  %v1245_v10 = vld [vmem:[#allocation5 + $0x10] sm:$0xff]   ;;  %p1400_p10 = scmp.ne.s32.totalorder %s1010_s23, %s1399_s24  ;;  %p1405_p12 = scmp.lt.s32.totalorder %s1399_s24, %s1399_s24 }
  0x3b   :  { %1130 = vmatpush3.bf16.msra.mxu1 %v1238_v3  ;;  %1109 = vmatprep.subr.bf16.mxu0 %v1239_v4  ;;  %v1246_v11 = vld [vmem:[#allocation5 + $0x90] sm:$0xff]   ;;  %v1247_v12 = vld [vmem:[#allocation5 + $0x58] sm:$0xff]   ;;  %v1251_v16 = vld [vmem:[#allocation5 + $0x60] sm:$0xff]  }
  0x3c   :  { %1131 = vmatprep.subr.bf16.mxu1 %v1240_v5  ;;  %v1248_v13 = vld [vmem:[#allocation5 + $0xd8] sm:$0xff]   ;;  %v1252_v17 = vld [vmem:[#allocation5 + $0xe0] sm:$0xff]   ;;  %v1255_v20 = vld [vmem:[#allocation5 + $0x68] sm:$0xff]   ;;  %p1406_p13 = por %p1405_p12, %p1404_p11 }
  0x3d   :  { %v1249_v14 = vld [vmem:[#allocation5 + $0x18] sm:$0xff]   ;;  %v1253_v18 = vld [vmem:[#allocation5 + $0x20] sm:$0xff]   ;;  %v1256_v21 = vld [vmem:[#allocation5 + $0xe8] sm:$0xff]  }
  0x3e   :  { %1110 = vmatpush3.bf16.msra.mxu0 %v1241_v6  ;;  %v1250_v15 = vld [vmem:[#allocation5 + $0x98] sm:$0xff]   ;;  %v1254_v19 = vld [vmem:[#allocation5 + $0xa0] sm:$0xff]   ;;  %v1257_v22 = vld [vmem:[#allocation5 + $0x28] sm:$0xff]   ;;  %p1407_p0 = pnand %p1406_p13, %p1400_p10 }
  0x3f   :  { %1132 = vmatpush3.bf16.msra.mxu1 %v1242_v7  ;;  %1111 = vmatprep.subr.bf16.mxu0 %v1243_v8  ;;  %v1258_v23 = vld [vmem:[#allocation5 + $0xa8] sm:$0xff]   ;;  %v1259_v24 = vld [vmem:[#allocation5 + $0x70] sm:$0xff]   ;;  %v1263_v28 = vld [vmem:[#allocation5 + $0x78] sm:$0xff]  }
  0x40   :  { %1133 = vmatprep.subr.bf16.mxu1 %v1244_v9  ;;  %v1260_v25 = vld [vmem:[#allocation5 + $0xf0] sm:$0xff]   ;;  %v1264_v29 = vld [vmem:[#allocation5 + $0xf8] sm:$0xff]   ;;  %v56_v32 = vld [vmem:[#allocation2 + $0x8] sm:$0xff] }
  0x41   :  { %v1261_v26 = vld [vmem:[#allocation5 + $0x30] sm:$0xff]   ;;  %v1265_v30 = vld [vmem:[#allocation5 + $0x38] sm:$0xff]   ;;  %v55_v34 = vld [vmem:[#allocation2] sm:$0xff]  ;;  %v64_v35 = vpack.c.bf16 %v56_v32, %v56_v32 }
  0x42   :  { %1112 = vmatpush3.bf16.msra.mxu0 %v1245_v10  ;;  %v1262_v27 = vld [vmem:[#allocation5 + $0xb0] sm:$0xff]   ;;  %v1266_v31 = vld [vmem:[#allocation5 + $0xb8] sm:$0xff]   ;;  %v63_v37 = vpack.c.bf16 %v55_v34, %v55_v34  ;;  %v1267_v40 = vld [vmem:[#allocation5 + $0x140] sm:$0xff]  }
  0x43   :  { %1134 = vmatpush3.bf16.msra.mxu1 %v1246_v11  ;;  %1113 = vmatprep.subr.bf16.mxu0 %v1247_v12  ;;  %v58_v33 = vld [vmem:[#allocation2 + $0x18] sm:$0xff]  ;;  %v57_v38 = vld [vmem:[#allocation2 + $0x10] sm:$0xff]  ;;  %v1268_v41 = vld [vmem:[#allocation5 + $0x1c0] sm:$0xff]  }
  0x44   :  { %1135 = vmatprep.subr.bf16.mxu1 %v1248_v13  ;;  %v66_v36 = vpack.c.bf16 %v58_v33, %v58_v33  ;;  %v65_v39 = vpack.c.bf16 %v57_v38, %v57_v38  ;;  %621 = vmatprep.mubr.bf16.mxu0 %v64_v35  ;;  %v1269_v42 = vld [vmem:[#allocation5 + $0x100] sm:$0xff]   ;;  %v1271_v44 = vld [vmem:[#allocation5 + $0x148] sm:$0xff]   ;;  %v1275_v48 = vld [vmem:[#allocation5 + $0x150] sm:$0xff]  }
  0x45   :  { %v1270_v43 = vld [vmem:[#allocation5 + $0x180] sm:$0xff]   ;;  %v1272_v45 = vld [vmem:[#allocation5 + $0x1c8] sm:$0xff]   ;;  %v1276_v49 = vld [vmem:[#allocation5 + $0x1d0] sm:$0xff]  }
  0x46   :  { %1114 = vmatpush3.bf16.msra.mxu0 %v1249_v14  ;;  %661 = vmatprep.mubr.bf16.mxu1 %v66_v36  ;;  %v1273_v46 = vld [vmem:[#allocation5 + $0x108] sm:$0xff]   ;;  %v1277_v50 = vld [vmem:[#allocation5 + $0x110] sm:$0xff]   ;;  %v1279_v52 = vld [vmem:[#allocation5 + $0x158] sm:$0xff]  }
  0x47   :  { %1136 = vmatpush3.bf16.msra.mxu1 %v1250_v15  ;;  %1115 = vmatprep.subr.bf16.mxu0 %v1251_v16  ;;  %v1274_v47 = vld [vmem:[#allocation5 + $0x188] sm:$0xff]   ;;  %v1278_v51 = vld [vmem:[#allocation5 + $0x190] sm:$0xff]   ;;  %v1280_v53 = vld [vmem:[#allocation5 + $0x1d8] sm:$0xff]  }
  0x48   :  { %1137 = vmatprep.subr.bf16.mxu1 %v1252_v17  ;;  %v1281_v54 = vld [vmem:[#allocation5 + $0x118] sm:$0xff]   ;;  %v1283_v56 = vld [vmem:[#allocation5 + $0x160] sm:$0xff]   ;;  %v1287_v60 = vld [vmem:[#allocation5 + $0x168] sm:$0xff]  }
  0x49   :  { %v1282_v55 = vld [vmem:[#allocation5 + $0x198] sm:$0xff]   ;;  %v1284_v57 = vld [vmem:[#allocation5 + $0x1e0] sm:$0xff]   ;;  %v1288_v61 = vld [vmem:[#allocation5 + $0x1e8] sm:$0xff]  }
  0x4a   :  { %1116 = vmatpush3.bf16.msra.mxu0 %v1253_v18  ;;  %v1285_v58 = vld [vmem:[#allocation5 + $0x120] sm:$0xff]   ;;  %v1289_v62 = vld [vmem:[#allocation5 + $0x128] sm:$0xff]   ;;  %v1291_v0 = vld [vmem:[#allocation5 + $0x170] sm:$0xff]   ;;  %v1434_v18 = vmov 0.0  }
  0x4b   :  { %1138 = vmatpush3.bf16.msra.mxu1 %v1254_v19  ;;  %1117 = vmatprep.subr.bf16.mxu0 %v1255_v20  ;;  %v1286_v59 = vld [vmem:[#allocation5 + $0x1a0] sm:$0xff]   ;;  %v1290_v63 = vld [vmem:[#allocation5 + $0x1a8] sm:$0xff]   ;;  %v1292_v1 = vld [vmem:[#allocation5 + $0x1f0] sm:$0xff]  }
  0x4c   :  { %1139 = vmatprep.subr.bf16.mxu1 %v1256_v21  ;;  %v1293_v2 = vld [vmem:[#allocation5 + $0x130] sm:$0xff]   ;;  %v1295_v4 = vld [vmem:[#allocation5 + $0x178] sm:$0xff]   ;;  %v60_v8 = vld [vmem:[#allocation2 + $0x28] sm:$0xff] }
  0x4d   :  { %v1294_v3 = vld [vmem:[#allocation5 + $0x1b0] sm:$0xff]   ;;  %v1296_v5 = vld [vmem:[#allocation5 + $0x1f8] sm:$0xff]   ;;  %v68_v10 = vpack.c.bf16 %v60_v8, %v60_v8  ;;  %v59_v12 = vld [vmem:[#allocation2 + $0x20] sm:$0xff] }
  0x4e   :  { %1118 = vmatpush3.bf16.msra.mxu0 %v1257_v22  ;;  %v1297_v6 = vld [vmem:[#allocation5 + $0x138] sm:$0xff]   ;;  %v61_v13 = vld [vmem:[#allocation2 + $0x30] sm:$0xff]  ;;  %v67_v14 = vpack.c.bf16 %v59_v12, %v59_v12  ;;  %v1305_v20 = vld [vmem:[#allocation7 + $0x1c] ss:$12 sps:$4 sm:$0xff]  }
  0x4f   :  { %1140 = vmatpush3.bf16.msra.mxu1 %v1258_v23  ;;  %1119 = vmatprep.subr.bf16.mxu0 %v1259_v24  ;;  %v1298_v7 = vld [vmem:[#allocation5 + $0x1b8] sm:$0xff]   ;;  %v69_v15 = vpack.c.bf16 %v61_v13, %v61_v13  ;;  %v1299_v16 = vld [vmem:[#allocation7] ss:$12 sps:$4 sm:$0xff]   ;;  %v1301_v17 = vld [vmem:[#allocation7 + $0x4] ss:$12 sps:$4 sm:$0xff]  }
  0x50   :  { %1141 = vmatprep.subr.bf16.mxu1 %v1260_v25  ;;  %v62_v9 = vld [vmem:[#allocation2 + $0x38] sm:$0xff]  ;;  %v1306_v22 = vld [vmem:[#allocation7 + $0x20] ss:$12 sps:$4 sm:$0xff]   ;;  %v1307_v24 = vld [vmem:[#allocation7 + $0x30] ss:$12 sps:$4 sm:$0xff]  }
  0x51   :  { %v70_v11 = vpack.c.bf16 %v62_v9, %v62_v9  ;;  %v1302_v19 = vld [vmem:[#allocation7 + $0x8] ss:$12 sps:$4 sm:$0xff]   ;;  %v1303_v21 = vld [vmem:[#allocation7 + $0x18] ss:$12 sps:$4 sm:$0xff]   ;;  %v1322_v34 = vld [vmem:[#allocation7 + $0x80] ss:$12 sps:$4 sm:$0xff]  }
  0x52   :  { %1120 = vmatpush3.bf16.msra.mxu0 %v1261_v26  ;;  %v1309_v23 = vld [vmem:[#allocation7 + $0x34] ss:$12 sps:$4 sm:$0xff]   ;;  %v1310_v25 = vld [vmem:[#allocation7 + $0x38] ss:$12 sps:$4 sm:$0xff]   ;;  %v1321_v32 = vld [vmem:[#allocation7 + $0x7c] ss:$12 sps:$4 sm:$0xff]  }
  0x53   :  { %1142 = vmatpush3.bf16.msra.mxu1 %v1262_v27  ;;  %1121 = vmatprep.subr.bf16.mxu0 %v1263_v28  ;;  %v1313_v26 = vld [vmem:[#allocation7 + $0x4c] ss:$12 sps:$4 sm:$0xff]   ;;  %v1311_v27 = vld [vmem:[#allocation7 + $0x48] ss:$12 sps:$4 sm:$0xff]   ;;  %v1314_v28 = vld [vmem:[#allocation7 + $0x50] ss:$12 sps:$4 sm:$0xff]  }
  0x54   :  { %1143 = vmatprep.subr.bf16.mxu1 %v1264_v29  ;;  %v1317_v29 = vld [vmem:[#allocation7 + $0x64] ss:$12 sps:$4 sm:$0xff]   ;;  %v1325_v35 = vld [vmem:[#allocation7 + $0x94] ss:$12 sps:$4 sm:$0xff]   ;;  %v1329_v38 = vld [vmem:[#allocation7 + $0xac] ss:$12 sps:$4 sm:$0xff]  }
  0x55   :  { %v1319_v33 = vld [vmem:[#allocation7 + $0x78] ss:$12 sps:$4 sm:$0xff]   ;;  %v1323_v36 = vld [vmem:[#allocation7 + $0x90] ss:$12 sps:$4 sm:$0xff]  }
  0x56   :  { %1122 = vmatpush3.bf16.msra.mxu0 %v1265_v30  ;;  %v1315_v30 = vld [vmem:[#allocation7 + $0x60] ss:$12 sps:$4 sm:$0xff]  }
  0x57   :  { %1144 = vmatpush3.bf16.msra.mxu1 %v1266_v31  ;;  %1151 = vmatprep.subr.bf16.mxu0 %v1267_v40  ;;  %v1318_v31 = vld [vmem:[#allocation7 + $0x68] ss:$12 sps:$4 sm:$0xff]   ;;  %v1330_v40 = vld [vmem:[#allocation7 + $0xb0] ss:$12 sps:$4 sm:$0xff]  }
  0x58   :  { %1173 = vmatprep.subr.bf16.mxu1 %v1268_v41  ;;  %v1435_v41 = vmov 0  }
  0x59   :  { %622 = vmatmul.mubr.bf16.vlgmr.msra.gmra.mrb[0].mxu0 %v63_v37  ;;  %v1326_v37 = vld [vmem:[#allocation7 + $0x98] ss:$12 sps:$4 sm:$0xff]  }
  0x5a   :  { %662 = vmatmul.mubr.bf16.vlgmr.msra.gmra.mrb[0].mxu1 %v65_v39  ;;  %1152 = vmatpush3.bf16.msra.mxu0 %v1269_v42  ;;  %v1327_v39 = vld [vmem:[#allocation7 + $0xa8] ss:$12 sps:$4 sm:$0xff]   ;;  %v201_v42 = vlaneseq }
  0x5b   :  { %1174 = vmatpush3.bf16.msra.mxu1 %v1270_v43  ;;  %1153 = vmatprep.subr.bf16.mxu0 %v1271_v44  ;;  %v199_v44 = vld [vmem:[#allocation5 + $0x200] sm:$0x1] }
  0x5c   :  { %1175 = vmatprep.subr.bf16.mxu1 %v1272_v45  ;;  %701 = vmatprep.mubr.bf16.mxu0 %v68_v10  ;;  %v202_v43 = vshrl.u32 %v201_v42, 7  ;;  %v200_v45 = vunpack.c.l.bf16 %v199_v44 }
  0x5d   :  { %741 = vmatprep.mubr.bf16.mxu1 %v70_v11 }
  0x5e   :  { %1154 = vmatpush3.bf16.msra.mxu0 %v1273_v46  ;;  %v203_v46 = vsub.s32 0, %v202_v43 }
  0x5f   :  { %1176 = vmatpush3.bf16.msra.mxu1 %v1274_v47  ;;  %1155 = vmatprep.subr.bf16.mxu0 %v1275_v48 }
  0x60   :  { %1177 = vmatprep.subr.bf16.mxu1 %v1276_v49  ;;  %v204_v49 = vrot.slane %v200_v45, %v203_v46 }
  0x62   :  { %1156 = vmatpush3.bf16.msra.mxu0 %v1277_v50 }
  0x63   :  { %1178 = vmatpush3.bf16.msra.mxu1 %v1278_v51  ;;  %1157 = vmatprep.subr.bf16.mxu0 %v1279_v52 }
  0x64   :  { %1179 = vmatprep.subr.bf16.mxu1 %v1280_v53 }
  0x66   :  { %1158 = vmatpush3.bf16.msra.mxu0 %v1281_v54 }
  0x67   :  { %1180 = vmatpush3.bf16.msra.mxu1 %v1282_v55  ;;  %1159 = vmatprep.subr.bf16.mxu0 %v1283_v56 }
  0x68   :  { %1181 = vmatprep.subr.bf16.mxu1 %v1284_v57 }
  0x6a   :  { %1160 = vmatpush3.bf16.msra.mxu0 %v1285_v58 }
  0x6b   :  { %1182 = vmatpush3.bf16.msra.mxu1 %v1286_v59  ;;  %1161 = vmatprep.subr.bf16.mxu0 %v1287_v60 }
  0x6c   :  { %1183 = vmatprep.subr.bf16.mxu1 %v1288_v61 }
  0x6e   :  { %1162 = vmatpush3.bf16.msra.mxu0 %v1289_v62 }
  0x6f   :  { %1184 = vmatpush3.bf16.msra.mxu1 %v1290_v63  ;;  %1163 = vmatprep.subr.bf16.mxu0 %v1291_v0 }
  0x70   :  { %1185 = vmatprep.subr.bf16.mxu1 %v1292_v1 }
  0x72   :  { %1164 = vmatpush3.bf16.msra.mxu0 %v1293_v2 }
  0x73   :  { %1186 = vmatpush3.bf16.msra.mxu1 %v1294_v3  ;;  %1165 = vmatprep.subr.bf16.mxu0 %v1295_v4 }
  0x74   :  { %1187 = vmatprep.subr.bf16.mxu1 %v1296_v5 }
  0x76   :  { %1166 = vmatpush3.bf16.msra.mxu0 %v1297_v6 }
  0x77   :  { %1188 = vmatpush3.bf16.msra.mxu1 %v1298_v7  ;;  %911 = vmatprep.subr.bf16.mxu0 %v1301_v17 }
  0x78   :  { %1204 = vmatprep.subr.bf16.mxu1 %v1434_v18 }
  0x79   :  { %702 = vmatmul.mubr.bf16.vlgmr.msra.gmra.mrb[4].mxu0 %v67_v14 }
  0x7a   :  { %742 = vmatmul.mubr.bf16.vlgmr.msra.gmra.mrb[4].mxu1 %v69_v15  ;;  %912 = vmatpush1.bf16.msra.mxu0 %v1299_v16 }
  0x7b   :  { %1205 = vmatpush3.bf16.msra.mxu1 %v1302_v19  ;;  %913 = vmatprep.subr.bf16.mxu0 %v1305_v20 }
  0x7c   :  { %1206 = vmatprep.subr.bf16.mxu1 %v1434_v18  ;;  %943 = vmatprep.mubr.bf16.mxu0 %v1435_v41 }
  0x7d   :  { %1220 = vmatprep.mubr.msk.bf16.mxu1 %vm1436_vm0, %v1434_v18 }
  0x7e   :  { %914 = vmatpush1.bf16.msra.mxu0 %v1303_v21 }
  0x7f   :  { %1207 = vmatpush3.bf16.msra.mxu1 %v1306_v22  ;;  %915 = vmatprep.subr.bf16.mxu0 %v1309_v23 }
  0x80   :  { %1208 = vmatprep.subr.bf16.mxu1 %v1434_v18 }
  0x82   :  { %916 = vmatpush1.bf16.msra.mxu0 %v1307_v24 }
  0x83   :  { %1209 = vmatpush3.bf16.msra.mxu1 %v1310_v25  ;;  %917 = vmatprep.subr.bf16.mxu0 %v1313_v26 }
  0x84   :  { %1210 = vmatprep.subr.bf16.mxu1 %v1434_v18 }
  0x86   :  { %918 = vmatpush1.bf16.msra.mxu0 %v1311_v27 }
  0x87   :  { %1211 = vmatpush3.bf16.msra.mxu1 %v1314_v28  ;;  %919 = vmatprep.subr.bf16.mxu0 %v1317_v29 }
  0x88   :  { %1212 = vmatprep.subr.bf16.mxu1 %v1434_v18 }
  0x8a   :  { %920 = vmatpush1.bf16.msra.mxu0 %v1315_v30 }
  0x8b   :  { %1213 = vmatpush3.bf16.msra.mxu1 %v1318_v31  ;;  %921 = vmatprep.subr.bf16.mxu0 %v1321_v32 }
  0x8c   :  { %1214 = vmatprep.subr.bf16.mxu1 %v1434_v18 }
  0x8e   :  { %922 = vmatpush1.bf16.msra.mxu0 %v1319_v33 }
  0x8f   :  { %1215 = vmatpush3.bf16.msra.mxu1 %v1322_v34  ;;  %923 = vmatprep.subr.bf16.mxu0 %v1325_v35 }
  0x90   :  { %1216 = vmatprep.subr.bf16.mxu1 %v1434_v18 }
  0x92   :  { %924 = vmatpush1.bf16.msra.mxu0 %v1323_v36 }
  0x93   :  { %1217 = vmatpush3.bf16.msra.mxu1 %v1326_v37  ;;  %925 = vmatprep.subr.bf16.mxu0 %v1329_v38 }
  0x94   :  { %1218 = vmatprep.subr.bf16.mxu1 %v1434_v18  ;;  %v997_v18 = vsub.s32 1, %v202_v43 }
  0x96   :  { %926 = vmatpush1.bf16.msra.mxu0 %v1327_v39  ;;  %v998_v19 = vrot.slane %v200_v45, %v997_v18 }
  0x97   :  { %1219 = vmatpush3.bf16.msra.mxu1 %v1330_v40 }
 0x12c   :  { %v1123_v47 = vpop.f32.mrb[0].mxu0 }
 0x12d   :  { %v1145_v48 = vpop.f32.mrb[0].mxu1  ;;  %v1124_v50 = vpop.f32.mrb[1].mxu0 }
 0x12e   :  { %v1146_v51 = vpop.f32.mrb[1].mxu1  ;;  %v1125_v52 = vadd.f32 %v1124_v50, %v1123_v47  ;;  %v1126_v54 = vpop.f32.mrb[2].mxu0 }
 0x12f   :  { %v1147_v53 = vadd.f32 %v1146_v51, %v1145_v48  ;;  %v1148_v55 = vpop.f32.mrb[2].mxu1  ;;  %v1127_v56 = vpop.f32.mrb[3].mxu0 }
 0x130   :  { %v1149_v57 = vpop.f32.mrb[3].mxu1  ;;  %v624_v58 = vadd.f32 %v1125_v52, %v204_v49 }
 0x132   :  { %v664_v59 = vadd.f32 %v1147_v53, %v624_v58 }
 0x14c   :  { %v1167_v60 = vpop.f32.mrb[4].mxu0 }
 0x14d   :  { %v1189_v61 = vpop.f32.mrb[4].mxu1  ;;  %v1168_v62 = vpop.f32.mrb[5].mxu0 }
 0x14e   :  { %v1169_v63 = vadd.f32 %v1168_v62, %v1167_v60  ;;  %v1190_v0 = vpop.f32.mrb[5].mxu1  ;;  %v1170_v1 = vpop.f32.mrb[6].mxu0 }
 0x14f   :  { %v1191_v2 = vadd.f32 %v1190_v0, %v1189_v61  ;;  %v1192_v3 = vpop.f32.mrb[6].mxu1  ;;  %v1171_v4 = vpop.f32.mrb[7].mxu0 }
 0x150   :  { %v704_v5 = vadd.f32 %v1169_v63, %v664_v59  ;;  %v1193_v6 = vpop.f32.mrb[7].mxu1 }
 0x152   :  { %v744_v7 = vadd.f32 %v1191_v2, %v704_v5 }
 0x154   :  { %v749_v8 = vmax.f32 %v744_v7, 0.0 }
 0x156   :  { %v750_v9 = vpack.c.bf16 %v749_v8, %v749_v8 }
 0x158   :  { %944 = vmatmul.mubr.bf16.vlgmr.msra.gmra.mrb[8].mxu0 %v750_v9  ;;  %1221 = vmatmul.mubr.bf16.vlgmr.msra.gmra.mrb[8].mxu1 %v750_v9 }
 0x22b   :  { %v945_v10 = vpop.f32.mrb[8].mxu0  ;;  %v986_v11 = vpop.f32.mrb[8].mxu1 }
 0x22c   :  { %992 = vst [vmem:[#allocation8] sm:$0xff] %v945_v10  ;;  %1331 = vtanh.f32 %v986_v11  ;;  %v947_v12 = vpop.f32.mrb[9].mxu0  ;;  %v1222_v13 = vpop.f32.mrb[9].mxu1 }
 0x22d   :  { %993 = vst [vmem:[#allocation8 + $0x8] sm:$0xff] %v947_v12  ;;  %v949_v14 = vpop.f32.mrb[10].mxu0  ;;  %v989_v15 = vpop.f32.mrb[10].mxu1 }
 0x22e   :  { %v950_v16 = vpop.f32.mrb[11].mxu0  ;;  %v1223_v17 = vpop.f32.mrb[11].mxu1 }
 0x236   :  { %v1332_v20 = vpop.eup %1331 }
 0x237   :  { %v999_v21 = vmul.f32 %v1332_v20, %v998_v19 }
 0x239   :  { %1000 = vadd.xlane.f32.xlu0 %v999_v21 }
 0x2c6   :  { %v1001_v22 = vpop.xlane.xlu0 %1000 }
 0x2c7   :  { %1002 = vst [vmem:[#allocation8 + $0x10] sm:$0xff] %v1001_v22 }
 0x2c8   :  { %1410 = shalt.err (!%p1407_p0)
}
 0x2c9   :  { %s1411_s27 = scalar_lea.hbm %s1509_s3, 384 }
 0x2ca   :  { %p1412_p1 = scmp.ne.s32.totalorder %s1509_s3, %s1411_s27  ;;  %p1415_p2 = scmp.lt.u32.totalorder %s1411_s27, %s1509_s3 }
 0x2cc   :  { %p1417_p3 = pnand %p1415_p2, %p1412_p1 }
 0x2ce   :  { %1420 = shalt.err (!%p1417_p3)
}
 0x2cf   :  { %1012 = dma.vmem_to_hbm [thread:$0]  %s1010_s23, 384, %s1509_s3, [#allocation4]  }
 0x2d0   :  { %1425 = dma.done.wait [#allocation4], 384  }
 0x2d1   :  { %1426 = vsyncadd [#allocation4], 4294966912 }
 0x2d2   :  { %1016 = vsyncpa [#allocation3], 1 }
 0x2d3   :  { %1017 = vsyncpa [#allocation6], 1 }
 0x2d4   :  { %1018 = vsyncpa [#allocation4], 1 }

</bundles_post_ra>
